<compile_context>
chip_gen: v5e
topology: v5e:2x2
jax: 0.10.0
libtpu: 0.0.40
codegen_flags: <defaults>
</compile_context>

<pallas_src>
import functools

import jax
import jax.numpy as jnp
from jax.experimental import pallas as pl
from jax.experimental.pallas import tpu as pltpu


def _round_up(x, m):
    return ((x + m - 1) // m) * m


def _fused_stack_kernel(a_ref, x0_ref, w_ref, b_ref, o_ref, h_ref, *,
                        tile_n, c_pad, num_layers):
    l = pl.program_id(0)   # layer index (outer, sequential)
    i = pl.program_id(1)   # destination-row tile (inner, sequential)

    # Load the initial node features into the ping-pong scratch once.
    @pl.when(jnp.logical_and(l == 0, i == 0))
    def _():
        h_ref[0] = x0_ref[...]

    src = l % 2
    dst = (l + 1) % 2
    h_src = h_ref.at[src]
    h_dst = h_ref.at[dst]

    # Neighbor aggregation for this row tile: A[tile, :] @ H  (bf16 MXU, f32 acc).
    a_tile = a_ref[...]                                           # [tile_n, N_pad] bf16
    h_full = h_src[...]                                           # [N_pad, c_pad] bf16
    agg = jnp.dot(a_tile, h_full, preferred_element_type=jnp.float32)

    # Root path only needs this tile's rows of H.
    row0 = pl.multiple_of(i * tile_n, tile_n)
    h_tile = h_src[pl.ds(row0, tile_n), :]                        # [tile_n, c_pad] bf16

    w_rel = w_ref[0, :c_pad, :]                                   # [c_pad, c_pad] bf16
    w_root = w_ref[0, c_pad:, :]                                  # [c_pad, c_pad] bf16
    out = (jnp.dot(agg.astype(jnp.bfloat16), w_rel, preferred_element_type=jnp.float32)
           + jnp.dot(h_tile, w_root, preferred_element_type=jnp.float32)
           + b_ref[0])                                            # [tile_n, c_pad] f32

    # LeakyReLU(0.1) on all but the last layer (slope 1.0 == identity there).
    neg_slope = jnp.where(l < num_layers - 1, jnp.float32(0.1), jnp.float32(1.0))
    out = jnp.where(out > 0, out, neg_slope * out)

    o_ref[...] = out                                              # lane-dense f32 store
    h_dst[pl.ds(row0, tile_n), :] = out.astype(h_ref.dtype)       # feed next layer


def init_params(key, in_channels, out_channels, num_layers, num_filters):
    """Per-layer (w_rel [Cin,Cout], w_root [Cin,Cout], b [1,Cout]), pre-transposed."""
    dims = [in_channels] + list(num_filters) + [out_channels]
    params = []
    for i in range(len(dims) - 1):
        cin, cout = dims[i], dims[i + 1]
        key, k1, k2, k3 = jax.random.split(key, 4)
        scale = 1.0 / jnp.sqrt(jnp.float32(cin))
        w_rel = jax.random.uniform(k1, (cin, cout), jnp.float32, -scale, scale)
        w_root = jax.random.uniform(k2, (cin, cout), jnp.float32, -scale, scale)
        b = jax.random.uniform(k3, (1, cout), jnp.float32, -scale, scale)
        params.append((w_rel, w_root, b))
    return params


def flow_ml_convolution(x, edge_index, params):
    """x: [N, Cin] f32, edge_index: [2, E] int32 -> [N, Cout] f32."""
    n, c_in = x.shape
    num_layers = len(params)
    dims = [c_in] + [w.shape[1] for (w, _, _) in params]
    c_out = dims[-1]
    c_pad = _round_up(max(dims), 128)

    # --- row-tile sizing (keep double-buffered bf16 A tiles within ~8 MiB) ---
    n16 = _round_up(n, 16)
    if n16 <= 512:
        tile_n = n16
    else:
        tile_n = max(16, min(512, ((4 * 1024 * 1024) // (2 * n16)) // 16 * 16))
    n_pad = _round_up(n, tile_n)
    num_tiles = n_pad // tile_n

    # --- dense adjacency with sum aggregation: A[dst, src] += 1 (glue) ---
    src, dst = edge_index[0], edge_index[1]
    a = (jnp.zeros((n_pad, n_pad), jnp.float32)
         .at[dst, src].add(1.0)).astype(jnp.bfloat16)

    # --- pad node features / stack per-layer weights into lane-dense slabs ---
    x0 = (jnp.zeros((n_pad, c_pad), jnp.float32).at[:n, :c_in].set(x)
          ).astype(jnp.bfloat16)
    w_all = jnp.zeros((num_layers, 2 * c_pad, c_pad), jnp.float32)
    b_all = jnp.zeros((num_layers, 1, c_pad), jnp.float32)
    for li, (w_rel, w_root, b) in enumerate(params):
        ci, co = w_rel.shape
        w_all = w_all.at[li, :ci, :co].set(w_rel)
        w_all = w_all.at[li, c_pad:c_pad + ci, :co].set(w_root)
        b_all = b_all.at[li, 0, :co].set(b[0])
    w_all = w_all.astype(jnp.bfloat16)

    kernel = functools.partial(_fused_stack_kernel, tile_n=tile_n, c_pad=c_pad,
                               num_layers=num_layers)
    out_pad = pl.pallas_call(
        kernel,
        out_shape=jax.ShapeDtypeStruct((n_pad, c_pad), jnp.float32),
        grid=(num_layers, num_tiles),
        in_specs=[
            pl.BlockSpec((tile_n, n_pad), lambda l, i: (i, 0)),           # A row tiles
            pl.BlockSpec((n_pad, c_pad), lambda l, i: (0, 0)),            # X0 (resident)
            pl.BlockSpec((1, 2 * c_pad, c_pad), lambda l, i: (l, 0, 0)),  # stacked W
            pl.BlockSpec((1, 1, c_pad), lambda l, i: (l, 0, 0)),          # bias
        ],
        out_specs=pl.BlockSpec((tile_n, c_pad), lambda l, i: (i, 0)),
        scratch_shapes=[pltpu.VMEM((2, n_pad, c_pad), jnp.bfloat16)],     # H ping-pong
        compiler_params=pltpu.CompilerParams(
            dimension_semantics=("arbitrary", "arbitrary")),
    )(a, x0, w_all, b_all)
    return out_pad[:n, :c_out]


def _reference(x, edge_index, params):
    """Pure-JAX reference mirroring the kernel's bf16-input / f32-accum numerics."""
    n = x.shape[0]
    a = (jnp.zeros((n, n), jnp.float32)
         .at[edge_index[1], edge_index[0]].add(1.0)).astype(jnp.bfloat16)
    h = x.astype(jnp.bfloat16)
    out = None
    num_layers = len(params)
    for li, (w_rel, w_root, b) in enumerate(params):
        agg = jnp.dot(a, h, preferred_element_type=jnp.float32)
        out = (jnp.dot(agg.astype(jnp.bfloat16), w_rel.astype(jnp.bfloat16),
                       preferred_element_type=jnp.float32)
               + jnp.dot(h, w_root.astype(jnp.bfloat16),
                         preferred_element_type=jnp.float32)
               + b)
        if li != num_layers - 1:
            out = jnp.where(out > 0, out, 0.1 * out)
        h = out.astype(jnp.bfloat16)
    return out


if __name__ == "__main__":
    key = jax.random.PRNGKey(0)

    # small synthetic graph (60 nodes exercises the node-padding path)
    num_nodes = 60
    in_channels = 4
    out_channels = 8
    num_layers = 2
    num_filters = [32, 16]
    num_edges = 256

    key, kx, ke = jax.random.split(key, 3)
    x = jax.random.normal(kx, (num_nodes, in_channels), jnp.float32)
    edge_index = jax.random.randint(ke, (2, num_edges), 0, num_nodes, jnp.int32)
    params = init_params(key, in_channels, out_channels, num_layers, num_filters)

    out = flow_ml_convolution(x, edge_index, params)
    out = jax.block_until_ready(out)

    ref = _reference(x, edge_index, params)
    assert out.shape == (num_nodes, out_channels)
    assert jnp.allclose(out, ref, atol=2e-3, rtol=2e-3), float(
        jnp.max(jnp.abs(out - ref)))

    print("KERNEL_OK")
</pallas_src>

<mosaic_0001>
module attributes {stable_mosaic.version = 11 : i64} {
  func.func @_fused_stack_kernel(%arg0: i32, %arg1: i32, %arg2: memref<64x64xbf16, #tpu.memory_space<vmem>>, %arg3: memref<64x128xbf16, #tpu.memory_space<vmem>>, %arg4: memref<1x256x128xbf16, #tpu.memory_space<vmem>>, %arg5: memref<1x1x128xf32, #tpu.memory_space<vmem>>, %arg6: memref<64x128xf32, #tpu.memory_space<vmem>>, %arg7: memref<2x64x128xbf16, #tpu.memory_space<vmem>>) attributes {dimension_semantics = [#tpu.dimension_semantics<arbitrary>, #tpu.dimension_semantics<arbitrary>], iteration_bounds = array<i64: 3, 1>, scalar_prefetch = 0 : i64, scratch_operands = 1 : i64, tpu.core_type = #tpu.core_type<tc>, window_params = [{transform_indices = @transform_0, window_bounds = array<i64: 64, 64>}, {pipeline_mode = #tpu.pipeline_mode<synchronous>, transform_indices = @transform_1, window_bounds = array<i64: 64, 128>}, {transform_indices = @transform_2, window_bounds = array<i64: 1, 256, 128>}, {transform_indices = @transform_3, window_bounds = array<i64: 1, 1, 128>}, {transform_indices = @transform_4, window_bounds = array<i64: 64, 128>}]} {
    %c0_i32 = arith.constant 0 : i32
    %0 = arith.cmpi eq, %arg0, %c0_i32 : i32
    %c0_i32_0 = arith.constant 0 : i32
    %1 = arith.cmpi eq, %arg1, %c0_i32_0 : i32
    %2 = arith.andi %0, %1 : i1
    %3 = arith.extui %2 : i1 to i32
    %c0_i32_1 = arith.constant 0 : i32
    %4 = arith.cmpi ne, %3, %c0_i32_1 : i32
    scf.if %4 {
      %c0_38 = arith.constant 0 : index
      %c0_39 = arith.constant 0 : index
      %62 = vector.load %arg3[%c0_38, %c0_39] : memref<64x128xbf16, #tpu.memory_space<vmem>>, vector<64x128xbf16>
      %c0_40 = arith.constant 0 : index
      %c0_41 = arith.constant 0 : index
      %c0_42 = arith.constant 0 : index
      %63 = vector.load %arg7[%c0_40, %c0_41, %c0_42] : memref<2x64x128xbf16, #tpu.memory_space<vmem>>, vector<1x64x128xbf16>
      %64 = vector.shape_cast %63 : vector<1x64x128xbf16> to vector<64x128xbf16>
      %65 = vector.shape_cast %62 : vector<64x128xbf16> to vector<1x64x128xbf16>
      tpu.vector_store %arg7[%c0_40, %c0_41, %c0_42], %65 {strides = array<i32>} : memref<2x64x128xbf16, #tpu.memory_space<vmem>>, vector<1x64x128xbf16>,
    } else {
    }
    %c2_i32 = arith.constant 2 : i32
    %c0_i32_2 = arith.constant 0 : i32
    %5 = arith.cmpi eq, %c2_i32, %c0_i32_2 : i32
    %c1_i32 = arith.constant 1 : i32
    %6 = arith.select %5, %c1_i32, %c2_i32 : i32
    %7 = arith.remsi %arg0, %6 : i32
    %c0_i32_3 = arith.constant 0 : i32
    %8 = arith.cmpi ne, %7, %c0_i32_3 : i32
    %c0_i32_4 = arith.constant 0 : i32
    %9 = arith.cmpi slt, %7, %c0_i32_4 : i32
    %c0_i32_5 = arith.constant 0 : i32
    %10 = arith.cmpi slt, %6, %c0_i32_5 : i32
    %11 = arith.xori %9, %10 : i1
    %12 = arith.andi %11, %8 : i1
    %13 = arith.addi %7, %6 : i32
    %14 = arith.select %12, %13, %7 : i32
    %c1_i32_6 = arith.constant 1 : i32
    %15 = arith.addi %arg0, %c1_i32_6 : i32
    %c2_i32_7 = arith.constant 2 : i32
    %c0_i32_8 = arith.constant 0 : i32
    %16 = arith.cmpi eq, %c2_i32_7, %c0_i32_8 : i32
    %c1_i32_9 = arith.constant 1 : i32
    %17 = arith.select %16, %c1_i32_9, %c2_i32_7 : i32
    %18 = arith.remsi %15, %17 : i32
    %c0_i32_10 = arith.constant 0 : i32
    %19 = arith.cmpi ne, %18, %c0_i32_10 : i32
    %c0_i32_11 = arith.constant 0 : i32
    %20 = arith.cmpi slt, %18, %c0_i32_11 : i32
    %c0_i32_12 = arith.constant 0 : i32
    %21 = arith.cmpi slt, %17, %c0_i32_12 : i32
    %22 = arith.xori %20, %21 : i1
    %23 = arith.andi %22, %19 : i1
    %24 = arith.addi %18, %17 : i32
    %25 = arith.select %23, %24, %18 : i32
    %c0 = arith.constant 0 : index
    %c0_13 = arith.constant 0 : index
    %26 = vector.load %arg2[%c0, %c0_13] : memref<64x64xbf16, #tpu.memory_space<vmem>>, vector<64x64xbf16>
    %27 = arith.index_cast %14 : i32 to index
    %c0_14 = arith.constant 0 : index
    %c0_15 = arith.constant 0 : index
    %28 = vector.load %arg7[%27, %c0_14, %c0_15] : memref<2x64x128xbf16, #tpu.memory_space<vmem>>, vector<1x64x128xbf16>
    %29 = vector.shape_cast %28 : vector<1x64x128xbf16> to vector<64x128xbf16>
    %cst = arith.constant dense<0.000000e+00> : vector<64x128xf32>
    %30 = tpu.matmul %26, %29, %cst {dimension_numbers = #tpu.dot_dimension_numbers<[1], [0], [0], [1], [0, 0, 1, 1], [], []>} : vector<64x64xbf16>, vector<64x128xbf16>, vector<64x128xf32> -> vector<64x128xf32>
    %c64_i32 = arith.constant 64 : i32
    %31 = arith.muli %arg1, %c64_i32 : i32
    %32 = tpu.assume_multiple %31, 64 : i32
    %c0_i32_16 = arith.constant 0 : i32
    %c0_i32_17 = arith.constant 0 : i32
    %33 = tpu.memref_slice %arg7[%14, %c0_i32_16, %c0_i32_17] : memref<2x64x128xbf16, #tpu.memory_space<vmem>> -> memref<1x64x128xbf16, #tpu.memory_space<vmem>>
    %34 = tpu.memref_squeeze %33 : memref<1x64x128xbf16, #tpu.memory_space<vmem>> -> memref<64x128xbf16, #tpu.memory_space<vmem>>
    %35 = arith.index_cast %32 : i32 to index
    %c0_18 = arith.constant 0 : index
    %36 = vector.load %34[%35, %c0_18] : memref<64x128xbf16, #tpu.memory_space<vmem>>, vector<64x128xbf16>
    %c0_19 = arith.constant 0 : index
    %c0_20 = arith.constant 0 : index
    %c0_21 = arith.constant 0 : index
    %37 = vector.load %arg4[%c0_19, %c0_20, %c0_21] : memref<1x256x128xbf16, #tpu.memory_space<vmem>>, vector<1x128x128xbf16>
    %38 = vector.shape_cast %37 : vector<1x128x128xbf16> to vector<128x128xbf16>
    %c0_22 = arith.constant 0 : index
    %c128 = arith.constant 128 : index
    %c0_23 = arith.constant 0 : index
    %39 = vector.load %arg4[%c0_22, %c128, %c0_23] : memref<1x256x128xbf16, #tpu.memory_space<vmem>>, vector<1x128x128xbf16>
    %40 = vector.shape_cast %39 : vector<1x128x128xbf16> to vector<128x128xbf16>
    %41 = arith.truncf %30 : vector<64x128xf32> to vector<64x128xbf16>
    %cst_24 = arith.constant dense<0.000000e+00> : vector<64x128xf32>
    %42 = tpu.matmul %41, %38, %cst_24 {dimension_numbers = #tpu.dot_dimension_numbers<[1], [0], [0], [1], [0, 0, 1, 1], [], []>} : vector<64x128xbf16>, vector<128x128xbf16>, vector<64x128xf32> -> vector<64x128xf32>
    %cst_25 = arith.constant dense<0.000000e+00> : vector<64x128xf32>
    %43 = tpu.matmul %36, %40, %cst_25 {dimension_numbers = #tpu.dot_dimension_numbers<[1], [0], [0], [1], [0, 0, 1, 1], [], []>} : vector<64x128xbf16>, vector<128x128xbf16>, vector<64x128xf32> -> vector<64x128xf32>
    %44 = arith.addf %42, %43 : vector<64x128xf32>
    %c0_26 = arith.constant 0 : index
    %c0_27 = arith.constant 0 : index
    %c0_28 = arith.constant 0 : index
    %45 = vector.load %arg5[%c0_26, %c0_27, %c0_28] : memref<1x1x128xf32, #tpu.memory_space<vmem>>, vector<1x1x128xf32>
    %46 = vector.shape_cast %45 : vector<1x1x128xf32> to vector<1x128xf32>
    %47 = vector.broadcast %46 : vector<1x128xf32> to vector<64x128xf32>
    %48 = arith.addf %44, %47 : vector<64x128xf32>
    %c2_i32_29 = arith.constant 2 : i32
    %49 = arith.cmpi slt, %arg0, %c2_i32_29 : i32
    %cst_30 = arith.constant 1.000000e-01 : f32
    %cst_31 = arith.constant 1.000000e+00 : f32
    %50 = arith.select %49, %cst_30, %cst_31 : f32
    %cst_32 = arith.constant 0.000000e+00 : f32
    %51 = vector.broadcast %cst_32 : f32 to vector<64x128xf32>
    %52 = arith.cmpf ogt, %48, %51 : vector<64x128xf32>
    %53 = vector.broadcast %50 : f32 to vector<64x128xf32>
    %54 = arith.mulf %53, %48 : vector<64x128xf32>
    %55 = arith.select %52, %48, %54 : vector<64x128xi1>, vector<64x128xf32>
    %c0_33 = arith.constant 0 : index
    %c0_34 = arith.constant 0 : index
    %56 = vector.load %arg6[%c0_33, %c0_34] : memref<64x128xf32, #tpu.memory_space<vmem>>, vector<64x128xf32>
    tpu.vector_store %arg6[%c0_33, %c0_34], %55 {strides = array<i32>} : memref<64x128xf32, #tpu.memory_space<vmem>>, vector<64x128xf32>,
    %57 = arith.truncf %55 : vector<64x128xf32> to vector<64x128xbf16>
    %c0_i32_35 = arith.constant 0 : i32
    %c0_i32_36 = arith.constant 0 : i32
    %58 = tpu.memref_slice %arg7[%25, %c0_i32_35, %c0_i32_36] : memref<2x64x128xbf16, #tpu.memory_space<vmem>> -> memref<1x64x128xbf16, #tpu.memory_space<vmem>>
    %59 = tpu.memref_squeeze %58 : memref<1x64x128xbf16, #tpu.memory_space<vmem>> -> memref<64x128xbf16, #tpu.memory_space<vmem>>
    %60 = arith.index_cast %32 : i32 to index
    %c0_37 = arith.constant 0 : index
    %61 = vector.load %59[%60, %c0_37] : memref<64x128xbf16, #tpu.memory_space<vmem>>, vector<64x128xbf16>
    tpu.vector_store %59[%60, %c0_37], %57 {strides = array<i32>} : memref<64x128xbf16, #tpu.memory_space<vmem>>, vector<64x128xbf16>,
    return
  }
  func.func @transform_0(%arg0: i32, %arg1: i32) -> (i32, i32) {
    %c0_i32 = arith.constant 0 : i32
    %c0_i32_0 = arith.constant 0 : i32
    return %arg1, %c0_i32 : i32, i32
  }
  func.func @transform_1(%arg0: i32, %arg1: i32) -> (i32, i32) {
    %c0_i32 = arith.constant 0 : i32
    %c0_i32_0 = arith.constant 0 : i32
    %c0_i32_1 = arith.constant 0 : i32
    return %c0_i32, %c0_i32_0 : i32, i32
  }
  func.func @transform_2(%arg0: i32, %arg1: i32) -> (i32, i32, i32) {
    %c0_i32 = arith.constant 0 : i32
    %c0_i32_0 = arith.constant 0 : i32
    %c0_i32_1 = arith.constant 0 : i32
    return %arg0, %c0_i32, %c0_i32_0 : i32, i32, i32
  }
  func.func @transform_3(%arg0: i32, %arg1: i32) -> (i32, i32, i32) {
    %c0_i32 = arith.constant 0 : i32
    %c0_i32_0 = arith.constant 0 : i32
    %c0_i32_1 = arith.constant 0 : i32
    return %arg0, %c0_i32, %c0_i32_0 : i32, i32, i32
  }
  func.func @transform_4(%arg0: i32, %arg1: i32) -> (i32, i32) {
    %c0_i32 = arith.constant 0 : i32
    %c0_i32_0 = arith.constant 0 : i32
    return %arg1, %c0_i32 : i32, i32
  }
}

</mosaic_0001>

<bundles_post_ra>
// kernel: tpu_custom_call.1
= control target key start
LH: loop header
LB: loop body
LE: loop exit
PB: predicated region body
PF: predicated region fallthrough
CT: control target
= control target key end

     0   :  { %s1631_s0 = inlined_call_operand.hbm [shape: bf16[64,64], index: 0, kind: input, shape index: {}]   ;;  %s1632_s1 = inlined_call_operand.hbm [shape: bf16[64,128], index: 1, kind: input, shape index: {}]   ;;  %s1633_s2 = inlined_call_operand.hbm [shape: bf16[3,256,128], index: 2, kind: input, shape index: {}]   ;;  %s1634_s3 = inlined_call_operand.hbm [shape: f32[3,1,128], index: 3, kind: input, shape index: {}]   ;;  %s1635_s4 = inlined_call_operand.hbm [shape: f32[64,128], index: 4, kind: output, shape index: {}]  }
   0x1   :  { %1640 = sst [smem:[#allocation15_spill]] %s1631_s0 }
   0x2   :  { %9 = vsyncpa [#allocation4], 0 }
   0x3   :  { %10 = vsyncpa [#allocation7], 0 }
   0x4   :  { %11 = vsyncpa [#allocation5], 0  ;;  %s1415_s15 = smov 0   ;;  %s1417_s16 = smov 0  }
   0x5   :  { %s1419_s17 = smov 0   ;;  %s1421_s18 = smov 0  }
   0x6   :  { %s1423_s19 = smov 0   ;;  %s1425_s20 = smov 0  }
   0x7 LB: > { %s1444_s21 = sadd.s32 4294967295, %s1381_s20   ;;  %p96_p0 = scmp.ne.s32.totalorder %s1365_s16, %s1361_s15  ;;  %s1381_s20 = sphi %s1425_s20, %s17_s20   ;;  %s1377_s19 = sphi %s1423_s19, %s1653_s19   ;;  %s1373_s18 = sphi %s1421_s18, %s1652_s18   ;;  %s1369_s17 = sphi %s1419_s17, %s1651_s17   ;;  %s1365_s16 = sphi %s1417_s16, %s1650_s16   ;;  %s1361_s15 = sphi %s1415_s15, %s1649_s15  }
   0x8   : > { %p97_p1 = scmp.eq.s32.totalorder %s1444_s21, 0  ;;  %p865_p2 = scmp.ge.s32.totalorder %s1381_s20, 1 }
   0x9   : > { %p159_p3 = scmp.lt.s32.totalorder %s1381_s20, 4  ;;  %s1642_s0 = sld [smem:[#allocation15_spill]] }
   0xa   : > { %p1452_p4 = por %p97_p1, %p96_p0  ;;  %s1383_s27 = smov [#allocation3]  }
   0xb   : > { %p1459_p5 = pnand %p865_p2, %p159_p3  ;;  %s175_s28 = sshll.u32 %s1383_s27, 4  ;;  %s176_s28 = int_to_ptr.vmem [resolvable:$true] %s175_s28 }
   0xc   : > { %s1636_s30 = smov 64   ;;  %s1638_s5 = smov 4  }
   0xd   : > { %p1094_p6 = pneg %p1459_p5  ;;  %s29_s6 = sadd.s32 1, %s1377_s19 }
   0xe   : > { %p31_p8 = scmp.ge.s32.totalorder %s29_s6, 3  ;;  %s83_s7 = sadd.s32 1, %s1369_s17 }
   0xf   : > { %s173_s25 = sshll.u32 %s1642_s0, 4  ;;  %p1467_p7 = pnand %p1094_p6, %p97_p1  ;;  %s174_s25 = int_to_ptr.hbm [resolvable:$true] %s173_s25 }
  0x10   : > { %p90_p9 = scmp.ne.s32.totalorder %s1369_s17, %s1365_s16  ;;  %p91_p10 = scmp.eq.s32.totalorder %s1381_s20, 0 }
  0x11   : > { %1097 = dma.hbm_to_vmem [thread:$0]  (!%p1467_p7), %s174_s25, 512, %s176_s28, [#allocation4], %s1636_s30, %s1636_s30, %s1638_s5  }
  0x12   : > { %s1655_s6 = smov (%p31_p8, %s29_s6), 0  ;;  %p1483_p11 = por %p91_p10, %p90_p9 }
  0x13   : > { %p1110_p12 = scmp.lt.s32.totalorder %s1381_s20, 3  ;;  %s80_s9 = ssub.s32 %s1377_s19, %s1655_s6 }
  0x14   : > { %s203_s10 = sand.u32 1, %s1381_s20   ;;  %p81_p13 = scmp.eq.s32.totalorder %s80_s9, 0 }
  0x15   : > { %s205_s11 = sand.u32 1, %s1369_s17   ;;  %s1007_s12 = sshll.u32 %s1377_s19, 7 }
  0x16   : > { %s1494_s13 = scalar_select %p81_p13, %s1369_s17, %s83_s7  }
  0x17   : > { %s869_s14 = sshll.u32 %s205_s11, 7  ;;  %s212_s24 = scalar_lea.hbm %s1633_s2, %s1007_s12 }
  0x18   : > { %s213_s25 = sshll.u32 %s212_s24, 4  ;;  %s207_s27 = scalar_lea.vmem [#allocation8], %s869_s14  ;;  %s214_s25 = int_to_ptr.hbm [resolvable:$true] %s213_s25 }
  0x19   : > { %s215_s28 = sshll.u32 %s207_s27, 4  ;;  %p1503_p0 = pnand %p1110_p12, %p1483_p11  ;;  %s216_s28 = int_to_ptr.vmem [resolvable:$true] %s215_s28 }
  0x1a   : > { %s187_s5 = sshll.u32 %s1632_s1, 4  ;;  %s204_s15 = scalar_lea.sflag [#allocation4], %s203_s10  ;;  %s188_s5 = int_to_ptr.hbm [resolvable:$true] %s187_s5 }
  0x1b   : > { %s1647_s12 = smov 4   ;;  %s1648_s23 = smov 64  }
  0x1c   : > { %1104 = dma.hbm_to_vmem [thread:$0]  (!%p1503_p0), %s214_s25, 2048, %s216_s28, %s204_s15, %s1648_s23, %s1648_s23, %s1647_s12  }
  0x1d   : > { %s1386_s14 = smov [#allocation6]   ;;  %s231_s0 = scalar_lea.hbm %s1634_s3, %s1377_s19 }
  0x1e   : > { %s189_s8 = sshll.u32 %s1386_s14, 4  ;;  %s233_s30 = sshll.u32 %s231_s0, 4  ;;  %s190_s8 = int_to_ptr.vmem [resolvable:$true] %s189_s8  ;;  %s234_s30 = int_to_ptr.hbm [resolvable:$true] %s233_s30 }
  0x1f   : > { %1100 = dma.hbm_to_vmem [thread:$0]  (!%p1467_p7), %s188_s5, 512, %s190_s8, [#allocation7], %s1648_s23, %s1648_s23, %s1647_s12  }
  0x20   : > { %s228_s7 = scalar_lea.vmem [#allocation9], %s205_s11  ;;  %244 = sbr.rel (%p1459_p5) target bundleno = 413 (0x19d), region = 36 }
  0x21   : > { %s235_s10 = sshll.u32 %s228_s7, 4  ;;  %s236_s10 = int_to_ptr.vmem [resolvable:$true] %s235_s10 }
  0x22   : > { %1107 = dma.hbm_to_vmem [thread:$0]  (!%p1503_p0), %s234_s30, 16, %s236_s10, %s204_s15  }
  0x25   : > { %1344 = dma.done.wait (%p97_p1), [#allocation4], 512  }
  0x26   : > { %1346 = vsyncadd (%p97_p1), [#allocation4], 4294966784 }
  0x27   : > { %1348 = dma.done.wait (%p97_p1), [#allocation7], 512  }
  0x28   : > { %1350 = vsyncadd (%p97_p1), [#allocation7], 4294966784  ;;  %s256_s0 = sand.u32 1, %s1444_s21   ;;  %s258_s29 = sand.u32 1, %s1365_s16  }
  0x29   : > { %s875_s5 = sshll.u32 %s258_s29, 7  ;;  %s257_s26 = scalar_lea.sflag [#allocation4], %s256_s0 }
  0x2a   : > { %s1538_s11 = scalar_lea.vmem [#allocation8], %s875_s5 }
  0x2b   : > { %1352 = dma.done.wait (%p1452_p4), %s257_s26, 2064  }
  0x2c   : > { %1354 = vsyncadd (%p1452_p4), %s257_s26, 4294965232  ;;  %p297_p2 = scmp.eq.s32.totalorder %s1373_s18, 0  ;;  %s1545_s25 = scalar_lea.vmem [#allocation9], %s258_s29 }
  0x2d   : > { %v303_v0 = vld [vmem:[#allocation6] sm:$0xff] (%p297_p2)   ;;  %v305_v1 = vld [vmem:[#allocation6 + $0x8] sm:$0xff] (%p297_p2)   ;;  %v307_v2 = vld [vmem:[#allocation6 + $0x10] sm:$0xff] (%p297_p2)  }
  0x2e   : > { %302 = sbr.rel (!%p297_p2) target bundleno = 51 (0x33), region = 56  ;;  %311 = vst [vmem:[#allocation2] sm:$0xff] (%p297_p2), %v303_v0   ;;  %v309_v3 = vld [vmem:[#allocation6 + $0x18] sm:$0xff] (%p297_p2)  }
  0x2f   : > { %313 = vst [vmem:[#allocation2 + $0x8] sm:$0xff] (%p297_p2), %v305_v1  }
  0x30   : > { %315 = vst [vmem:[#allocation2 + $0x10] sm:$0xff] (%p297_p2), %v307_v2  }
  0x31   : > { %317 = vst [vmem:[#allocation2 + $0x18] sm:$0xff] (%p297_p2), %v309_v3  }
  0x33 PF: > { %p319_p1 = scmp.lt.s32.totalorder %s1373_s18, 0  ;;  %s320_s22 = ssub.s32 0, %s1373_s18  ;;  %v1009_v8 = vld [vmem:[#allocation3] sm:$0xff]  ;;  %vm407_vm0 = vcmask 523264   ;;  %v1010_v9 = vld [vmem:[#allocation3 + $0x8] sm:$0xff]  ;;  %v1037_v10 = vld [vmem:[%s1538_s11 + $0x78] sm:$0xff] }
  0x34   : > { %s877_s28 = smin.u32 %s1373_s18, %s320_s22  ;;  %570 = vmatpush.bf16.msra.mxu1 %v1037_v10  ;;  %v1036_v11 = vld [vmem:[%s1538_s11 + $0x70] sm:$0xff]  ;;  %v1029_v12 = vld [vmem:[%s1538_s11 + $0x38] sm:$0xff]  ;;  %1062 = vmatpush.bf16.msra.mxu3 %v1037_v10  ;;  %v1035_v13 = vld [vmem:[%s1538_s11 + $0x68] sm:$0xff]  ;;  %s331_s8 = sadd.s32 1, %s1373_s18 }
  0x35   : > { %s322_s9 = sand.u32 1, %s877_s28   ;;  %1070 = vmatpush.bf16.msra.mxu2 %v1029_v12  ;;  %v1028_v14 = vld [vmem:[%s1538_s11 + $0x30] sm:$0xff]  ;;  %v1034_v15 = vld [vmem:[%s1538_s11 + $0x60] sm:$0xff]  ;;  %v1027_v16 = vld [vmem:[%s1538_s11 + $0x28] sm:$0xff]  ;;  %s333_s24 = ssub.s32 0, %s331_s8 }
  0x36   : > { %s323_s15 = ssub.s32 0, %s322_s9  ;;  %v1011_v17 = vld [vmem:[#allocation3 + $0x10] sm:$0xff]  ;;  %v1033_v18 = vld [vmem:[%s1538_s11 + $0x58] sm:$0xff]  ;;  %v1026_v19 = vld [vmem:[%s1538_s11 + $0x20] sm:$0xff]  ;;  %s880_s27 = smin.u32 %s333_s24, %s331_s8 }
  0x37   : > { %s1657_s15 = smov (!%p319_p1, %s323_s15), %s322_s9  ;;  %v1032_v20 = vld [vmem:[%s1538_s11 + $0x50] sm:$0xff]  ;;  %v1025_v21 = vld [vmem:[%s1538_s11 + $0x18] sm:$0xff]  ;;  %v1031_v22 = vld [vmem:[%s1538_s11 + $0x48] sm:$0xff]  ;;  %p688_p4 = scmp.lt.s32.totalorder %s1373_s18, 2 }
  0x38   : > { %p879_p3 = scmp.lt.s32.totalorder %s1657_s15, 0  ;;  %s329_s12 = sadd.s32 2, %s1657_s15  ;;  %571 = vmatpush.bf16.msra.mxu1 %v1036_v11  ;;  %1063 = vmatpush.bf16.msra.mxu3 %v1036_v11  ;;  %v1030_v23 = vld [vmem:[%s1538_s11 + $0x40] sm:$0xff]  ;;  %v1012_v24 = vld [vmem:[#allocation3 + $0x18] sm:$0xff]  ;;  %v1024_v26 = vld [vmem:[%s1538_s11 + $0x10] sm:$0xff] }
  0x39   : > { %1071 = vmatpush.bf16.msra.mxu2 %v1028_v14  ;;  %v1023_v27 = vld [vmem:[%s1538_s11 + $0x8] sm:$0xff]  ;;  %v1022_v28 = vld [vmem:[%s1538_s11] sm:$0xff]  ;;  %s335_s30 = sand.u32 1, %s880_s27   ;;  %p332_p5 = scmp.lt.s32.totalorder %s331_s8, 0 }
  0x3a   : > { %s1659_s12 = smov (!%p879_p3, %s329_s12), %s1657_s15  ;;  %s336_s7 = ssub.s32 0, %s335_s30  ;;  %v1583_v46 = vld [vmem:[%s1545_s25] ss:$0 sm:$0xff] }
  0x3b   : > { %s1013_s23 = sshll.u32 %s1659_s12, 5  ;;  %s1661_s7 = smov (!%p332_p5, %s336_s7), %s335_s30 }
  0x3c   : > { %s1550_s14 = scalar_lea.vmem [#allocation2], %s1013_s23  ;;  %572 = vmatpush.bf16.msra.mxu1 %v1035_v13  ;;  %1064 = vmatpush.bf16.msra.mxu3 %v1035_v13  ;;  %p882_p6 = scmp.lt.s32.totalorder %s1661_s7, 0 }
  0x3d   : > { %v1017_v4 = vld [vmem:[%s1550_s14 + $0x18] sm:$0xff]  ;;  %v1016_v5 = vld [vmem:[%s1550_s14 + $0x10] sm:$0xff]  ;;  %v1015_v6 = vld [vmem:[%s1550_s14 + $0x8] sm:$0xff]  ;;  %1072 = vmatpush.bf16.msra.mxu2 %v1027_v16  ;;  %s689_s10 = scalar_select %p688_p4, 0.1, 1.0 }
  0x3e   : > { %424 = vmatpush.bf16.msra.mxu0 %v1017_v4  ;;  %v1014_v7 = vld [vmem:[%s1550_s14] sm:$0xff]  ;;  %v1019_v29 = vld [vmem:[%s1550_s14 + $0x8] sm:$0xff]  ;;  %v1020_v31 = vld [vmem:[%s1550_s14 + $0x10] sm:$0xff]  ;;  %s342_s0 = sadd.s32 2, %s1661_s7  ;;  %s1387_s5 = smov [#allocation10]  }
  0x3f   : > { %v1018_v25 = vld [vmem:[%s1550_s14] sm:$0xff]  ;;  %v1021_v35 = vld [vmem:[%s1550_s14 + $0x18] sm:$0xff]  ;;  %v1585_v49 = vstv %s689_s10  ;;  %s1663_s0 = smov (!%p882_p6, %s342_s0), %s1661_s7  ;;  %s752_s26 = sshll.u32 %s1387_s5, 4  ;;  %s753_s26 = int_to_ptr.vmem [resolvable:$true] %s752_s26 }
  0x40   : > { %573 = vmatpush.bf16.msra.mxu1 %v1034_v15  ;;  %1065 = vmatpush.bf16.msra.mxu3 %v1034_v15  ;;  %s1038_s18 = sshll.u32 %s1663_s0, 5  ;;  %s754_s22 = sshll.u32 %s1635_s4, 4  ;;  %s755_s22 = int_to_ptr.hbm [resolvable:$true] %s754_s22 }
  0x41   : > { %1073 = vmatpush.bf16.msra.mxu2 %v1026_v19  ;;  %s1591_s29 = scalar_lea.vmem [#allocation2], %s1038_s18  ;;  %p1113_p7 = scmp.eq.s32.totalorder %s1444_s21, 2 }
  0x42   : > { %425 = vmatpush.bf16.msra.mxu0 %v1016_v5  ;;  %s1388_s28 = smov 128   ;;  %s1389_s9 = smov 8  }
  0x44   : > { %574 = vmatpush.bf16.msra.mxu1 %v1033_v18  ;;  %1066 = vmatpush.bf16.msra.mxu3 %v1033_v18 }
  0x45   : > { %1074 = vmatpush.bf16.msra.mxu2 %v1025_v21 }
  0x46   : > { %426 = vmatpush.bf16.msra.mxu0 %v1015_v6 }
  0x48   : > { %575 = vmatpush.bf16.msra.mxu1 %v1032_v20  ;;  %1067 = vmatpush.bf16.msra.mxu3 %v1032_v20 }
  0x49   : > { %1075 = vmatpush.bf16.msra.mxu2 %v1024_v26 }
  0x4a   : > { %427 = vmatpush.bf16.msra.mxu0 %v1014_v7 }
  0x4c   : > { %576 = vmatpush.bf16.msra.mxu1 %v1031_v22  ;;  %1068 = vmatpush.bf16.msra.mxu3 %v1031_v22 }
  0x4d   : > { %917 = vmatmul.msk.bf16.vlgmr.msra.gmra.mxu0 %vm407_vm0, %v1009_v8  ;;  %1076 = vmatpush.bf16.msra.mxu2 %v1023_v27 }
  0x50   : > { %577 = vmatpush.bf16.msra.mxu1 %v1030_v23  ;;  %1069 = vmatpush.bf16.msra.mxu3 %v1030_v23 }
  0x51   : > { %1077 = vmatpush.bf16.msra.mxu2 %v1022_v28 }
  0x53   : > { %578 = vmatmul.bf16.vlgmr.msra.gmra.mxu1 %v1018_v25  ;;  %583 = vmatmul.bf16.vlgmr.msra.gmra.mxu3 %v1019_v29 }
  0x54   : > { %647 = vmatpush.bf16.msrb.mxu1 %v1029_v12 }
  0x58   : > { %648 = vmatpush.bf16.msrb.mxu1 %v1028_v14 }
  0x5c   : > { %649 = vmatpush.bf16.msrb.mxu1 %v1027_v16 }
  0x5d   : > { %918 = vmatmul.msk.bf16.gmra.mxu0 %vm407_vm0, %v1010_v9 }
  0x60   : > { %650 = vmatpush.bf16.msrb.mxu1 %v1026_v19 }
  0x63   : > { %588 = vmatmul.bf16.gmra.mxu3 %v1020_v31 }
  0x64   : > { %651 = vmatpush.bf16.msrb.mxu1 %v1025_v21 }
  0x68   : > { %652 = vmatpush.bf16.msrb.mxu1 %v1024_v26 }
  0x6c   : > { %653 = vmatpush.bf16.msrb.mxu1 %v1023_v27 }
  0x6d   : > { %919 = vmatmul.msk.bf16.gmra.mxu0 %vm407_vm0, %v1011_v17 }
  0x70   : > { %654 = vmatpush.bf16.msrb.mxu1 %v1022_v28 }
  0x73   : > { %593 = vmatmul.bf16.gmra.mxu3 %v1021_v35 }
  0x7d   : > { %920 = vmatmul.msk.bf16.gmra.mxu0 %vm407_vm0, %v1012_v24 }
  0xca   : > { %v429_v30 = vpop.f32.mrf.mxu0 }
  0xd0   : > { %v579_v44 = vpop.f32.mrf.mxu1 }
  0xd2   : > { %v431_v32 = vpop.f32.mrf.mxu0 }
  0xd3   : > { %v494_v33 = vpack.c.bf16 %v431_v32, %v429_v30 }
  0xd5   : > { %655 = vmatmul.bf16.vlgmr.msrb.gmra.mxu1 %v494_v33 }
  0xd6   : > { %v584_v56 = vpop.f32.mrf.mxu3 }
  0xd8   : > { %v581_v45 = vpop.f32.mrf.mxu1 }
  0xda   : > { %v434_v34 = vpop.f32.mrf.mxu0 }
  0xde   : > { %v586_v60 = vpop.f32.mrf.mxu3 }
  0xe2   : > { %v436_v36 = vpop.f32.mrf.mxu0 }
  0xe3   : > { %v495_v37 = vpack.c.bf16 %v436_v36, %v434_v34 }
  0xe5   : > { %660 = vmatmul.bf16.vlgmr.msra.gmra.mxu2 %v495_v37 }
  0xe6   : > { %v589_v4 = vpop.f32.mrf.mxu3 }
  0xea   : > { %v439_v38 = vpop.f32.mrf.mxu0 }
  0xee   : > { %v591_v12 = vpop.f32.mrf.mxu3 }
  0xf2   : > { %v441_v39 = vpop.f32.mrf.mxu0 }
  0xf3   : > { %v496_v40 = vpack.c.bf16 %v441_v39, %v439_v38 }
  0xf5   : > { %665 = vmatmul.bf16.gmra.mxu2 %v496_v40 }
  0xf6   : > { %v594_v19 = vpop.f32.mrf.mxu3 }
  0xfa   : > { %v444_v41 = vpop.f32.mrf.mxu0 }
  0xfe   : > { %v596_v27 = vpop.f32.mrf.mxu3 }
 0x102   : > { %v446_v42 = vpop.f32.mrf.mxu0 }
 0x103   : > { %v497_v43 = vpack.c.bf16 %v446_v42, %v444_v41 }
 0x105   : > { %670 = vmatmul.bf16.gmra.mxu2 %v497_v43 }
 0x152   : > { %v656_v47 = vpop.f32.mrf.mxu1 }
 0x153   : > { %v657_v48 = vadd.f32 %v656_v47, %v579_v44 }
 0x155   : > { %v680_v50 = vadd.f32 %v1583_v46, %v657_v48 }
 0x157   : > { %vm690_vm1 = vcmp.gt.f32.partialorder %v680_v50, 0.0  ;;  %v699_v51 = vmul.f32 %v1585_v49, %v680_v50 }
 0x159   : > { %v707_v52 = vsel %vm690_vm1, %v680_v50, %v699_v51 }
 0x15a   : > { %715 = vst [vmem:[#allocation10] sm:$0xff] %v707_v52  ;;  %v658_v53 = vpop.f32.mrf.mxu1 }
 0x15b   : > { %v659_v54 = vadd.f32 %v658_v53, %v581_v45 }
 0x15d   : > { %v681_v55 = vadd.f32 %v1583_v46, %v659_v54 }
 0x15f   : > { %vm691_vm2 = vcmp.gt.f32.partialorder %v681_v55, 0.0  ;;  %v700_v57 = vmul.f32 %v1585_v49, %v681_v55 }
 0x161   : > { %v708_v58 = vsel %vm691_vm2, %v681_v55, %v700_v57 }
 0x162   : > { %716 = vst [vmem:[#allocation10 + $0x8] sm:$0xff] %v708_v58  ;;  %v1042_v59 = vpack.c.bf16 %v708_v58, %v707_v52 }
 0x164   : > { %1043 = vst [vmem:[%s1591_s29] sm:$0xff] %v1042_v59  }
 0x168   : > { %v661_v61 = vpop.f32.mrf.mxu2 }
 0x169   : > { %v662_v62 = vadd.f32 %v661_v61, %v584_v56 }
 0x16b   : > { %v682_v63 = vadd.f32 %v1583_v46, %v662_v62 }
 0x16d   : > { %vm692_vm3 = vcmp.gt.f32.partialorder %v682_v63, 0.0  ;;  %v701_v0 = vmul.f32 %v1585_v49, %v682_v63 }
 0x16f   : > { %v709_v1 = vsel %vm692_vm3, %v682_v63, %v701_v0 }
 0x170   : > { %717 = vst [vmem:[#allocation10 + $0x10] sm:$0xff] %v709_v1  ;;  %v663_v2 = vpop.f32.mrf.mxu2 }
 0x171   : > { %v664_v3 = vadd.f32 %v663_v2, %v586_v60 }
 0x173   : > { %v683_v5 = vadd.f32 %v1583_v46, %v664_v3 }
 0x175   : > { %vm693_vm4 = vcmp.gt.f32.partialorder %v683_v5, 0.0  ;;  %v702_v6 = vmul.f32 %v1585_v49, %v683_v5 }
 0x177   : > { %v710_v7 = vsel %vm693_vm4, %v683_v5, %v702_v6 }
 0x178   : > { %718 = vst [vmem:[#allocation10 + $0x18] sm:$0xff] %v710_v7  ;;  %v1047_v8 = vpack.c.bf16 %v710_v7, %v709_v1  ;;  %v666_v9 = vpop.f32.mrf.mxu2 }
 0x179   : > { %v667_v10 = vadd.f32 %v666_v9, %v589_v4 }
 0x17a   : > { %1059 = vst [vmem:[%s1591_s29 + $0x8] sm:$0xff] %v1047_v8  }
 0x17b   : > { %v684_v11 = vadd.f32 %v1583_v46, %v667_v10 }
 0x17d   : > { %vm694_vm5 = vcmp.gt.f32.partialorder %v684_v11, 0.0  ;;  %v703_v13 = vmul.f32 %v1585_v49, %v684_v11 }
 0x17f   : > { %v711_v14 = vsel %vm694_vm5, %v684_v11, %v703_v13 }
 0x180   : > { %719 = vst [vmem:[#allocation10 + $0x20] sm:$0xff] %v711_v14  ;;  %v668_v15 = vpop.f32.mrf.mxu2 }
 0x181   : > { %v669_v16 = vadd.f32 %v668_v15, %v591_v12 }
 0x183   : > { %v685_v17 = vadd.f32 %v1583_v46, %v669_v16 }
 0x185   : > { %vm695_vm6 = vcmp.gt.f32.partialorder %v685_v17, 0.0  ;;  %v704_v18 = vmul.f32 %v1585_v49, %v685_v17 }
 0x187   : > { %v712_v20 = vsel %vm695_vm6, %v685_v17, %v704_v18 }
 0x188   : > { %720 = vst [vmem:[#allocation10 + $0x28] sm:$0xff] %v712_v20  ;;  %v1052_v21 = vpack.c.bf16 %v712_v20, %v711_v14  ;;  %v671_v22 = vpop.f32.mrf.mxu2 }
 0x189   : > { %v672_v23 = vadd.f32 %v671_v22, %v594_v19 }
 0x18a   : > { %1060 = vst [vmem:[%s1591_s29 + $0x10] sm:$0xff] %v1052_v21  }
 0x18b   : > { %v686_v24 = vadd.f32 %v1583_v46, %v672_v23 }
 0x18d   : > { %vm696_vm7 = vcmp.gt.f32.partialorder %v686_v24, 0.0  ;;  %v705_v25 = vmul.f32 %v1585_v49, %v686_v24 }
 0x18f   : > { %v713_v26 = vsel %vm696_vm7, %v686_v24, %v705_v25 }
 0x190   : > { %721 = vst [vmem:[#allocation10 + $0x30] sm:$0xff] %v713_v26  ;;  %v673_v28 = vpop.f32.mrf.mxu2 }
 0x191   : > { %v674_v29 = vadd.f32 %v673_v28, %v596_v27 }
 0x193   : > { %v687_v30 = vadd.f32 %v1583_v46, %v674_v29 }
 0x195   : > { %vm697_vm8 = vcmp.gt.f32.partialorder %v687_v30, 0.0  ;;  %v706_v31 = vmul.f32 %v1585_v49, %v687_v30 }
 0x197   : > { %v714_v32 = vsel %vm697_vm8, %v687_v30, %v706_v31 }
 0x198   : > { %722 = vst [vmem:[#allocation10 + $0x38] sm:$0xff] %v714_v32  ;;  %v1057_v33 = vpack.c.bf16 %v714_v32, %v713_v26 }
 0x199   : > { %1091 = dma.vmem_to_hbm [thread:$0]  (%p1113_p7), %s753_s26, 1024, %s755_s22, [#allocation5], %s1388_s28, %s1388_s28, %s1389_s9  }
 0x19a   : > { %1061 = vst [vmem:[%s1591_s29 + $0x18] sm:$0xff] %v1057_v33  }
 0x19b   : > { %1356 = dma.done.wait (%p1113_p7), [#allocation5], 1024  }
 0x19c   : > { %1358 = vsyncadd (%p1113_p7), [#allocation5], 4294966272 }
 0x19d PF: > { %s17_s20 = sadd.s32 1, %s1381_s20   ;;  %s1649_s15 = smov %s1365_s16 }
 0x19e   : > { %p14_p8 = scmp.ge.s32.totalorder %s17_s20, 5   ;;  %s1650_s16 = smov %s1369_s17 }
 0x19f   : > { %s1651_s17 = smov %s1494_s13  ;;  %s1652_s18 = smov %s1377_s19 }
 0x1a0   : > { %s1653_s19 = smov %s1655_s6  ;;  %16 = sbr.rel (!%p14_p8) target bundleno = 7 (0x7), region = 101 }
 0x1a5   :  { %771 = vsyncpa [#allocation4], 1 }
 0x1a6   :  { %773 = vsyncpa [#allocation4 + $0x1], 1 }
 0x1a7   :  { %774 = vsyncpa [#allocation7], 1 }
 0x1a8   :  { %775 = vsyncpa [#allocation5], 1 }
 0x1a9   :  { %777 = vsyncpa [#allocation5 + $0x1], 1 }

</bundles_post_ra>
